<compile_context>
chip_gen: v6e
topology: v6e:2x2x1
jax: 0.10.0
libtpu: 0.0.40
codegen_flags: <defaults>
</compile_context>

<pallas_src>
import jax
import jax.numpy as jnp
from jax.experimental import pallas as pl
from jax.experimental.pallas import tpu as pltpu


def _affine_kernel(disc_ref, off_ref, x_ref, o_ref):
    # disc_ref: (K, 1)  discrimination column (pre-broadcast to K rows)
    # off_ref:  (K, 1)  sorted offsets column
    # x_ref:    (1, TL) per-example scalars, lane-dense
    # o_ref:    (K, TL) transposed logits, lane-dense unmasked stores
    #
    # The (K,1) x (1,TL) broadcasts fuse into the per-vreg mul/add chain
    # (Mosaic fuses elementwise chains within a block); the optional cast is
    # free VPU work in a store-bound regime.
    o_ref[...] = (disc_ref[...] * x_ref[...] + off_ref[...]).astype(o_ref.dtype)


def _round_up(n: int, m: int) -> int:
    return ((n + m - 1) // m) * m


def _vmem_capacity_bytes() -> int:
    try:
        return int(pltpu.get_tpu_info().vmem_capacity_bytes)
    except Exception:
        return 64 << 20  # v7x per-TC floor; conservative for v5e/v6e (128 MiB)


def element_wise_affine_kb(x, discrimination, offsets, *, out_dtype=jnp.float32,
                           max_tile_lanes=131072):
    """Lane-dense fast path: returns (K, B) = (discrimination * x + offsets)^T.

    x: (B, 1) or (B,).  discrimination: (1,) or (K,).  offsets: (K,).
    No wrapper-side transpose: consumers on the hot path take (K, B) directly.
    """
    x_row = jnp.asarray(x, jnp.float32).reshape(1, -1)          # (1, B)
    B = x_row.shape[1]
    K = int(offsets.shape[0])

    # Mode-agnostic params: broadcast discrimination to a (K, 1) column.
    disc_col = jnp.broadcast_to(
        jnp.asarray(discrimination, jnp.float32).reshape(-1, 1), (K, 1))
    off_col = jnp.asarray(offsets, jnp.float32).reshape(K, 1)

    if B < 128:
        # Below a single lane tile: not worth a pallas_call.
        return (disc_col * x_row + off_col).astype(out_dtype)

    out_itemsize = jnp.asarray(0, out_dtype).dtype.itemsize

    # --- lane tile selection -------------------------------------------------
    # Force 128-multiple tiles (lane constraint: otherwise masked vst.msk or a
    # lowering failure).
    max_tile_lanes = max(128, (int(max_tile_lanes) // 128) * 128)
    # Generation-aware VMEM cap: keep the double-buffered per-step footprint
    # (out block + x row) within ~1/4 of this TC's VMEM.
    vmem_cap = _vmem_capacity_bytes()
    per_lane_bytes = 2 * (K * out_itemsize + 4)                 # 2x double-buffered
    vmem_tile_cap = max(128, ((vmem_cap // 4) // per_lane_bytes) // 128 * 128)
    # >= 2 grid steps for large B so both v7x TensorCores issue stores; on
    # single-TC v5e/v6e the extra step is ~0.35us of noise.
    two_step_tile = _round_up(pl.cdiv(B, 2), 128)
    tile_lanes = max(128, min(two_step_tile, max_tile_lanes, vmem_tile_cap))
    num_tiles = pl.cdiv(B, tile_lanes)                          # ragged last block OK

    per_step_bytes = tile_lanes * (K * out_itemsize + 4) + 8 * K
    vmem_limit = int(min(max(2 * per_step_bytes + (4 << 20), 16 << 20), vmem_cap // 2))

    return pl.pallas_call(
        _affine_kernel,
        out_shape=jax.ShapeDtypeStruct((K, B), out_dtype),
        grid_spec=pltpu.PrefetchScalarGridSpec(
            num_scalar_prefetch=0,
            grid=(num_tiles,),
            in_specs=[
                pl.BlockSpec((K, 1), lambda i: (0, 0)),            # discrimination (VMEM-resident)
                pl.BlockSpec((K, 1), lambda i: (0, 0)),            # offsets        (VMEM-resident)
                pl.BlockSpec((1, tile_lanes), lambda i: (0, i)),   # x lane row
            ],
            out_specs=pl.BlockSpec((K, tile_lanes), lambda i: (0, i)),
        ),
        compiler_params=pltpu.CompilerParams(
            dimension_semantics=("parallel",),
            vmem_limit_bytes=vmem_limit,
        ),
    )(disc_col, off_col, x_row)


def element_wise_affine(x, discrimination, offsets, *, out_dtype=jnp.float32,
                        max_tile_lanes=131072, small_batch_threshold=16384):
    """PyTorch-parity wrapper: returns (B, K) logits (same broadcast semantics)."""
    x_flat = jnp.asarray(x, jnp.float32).reshape(-1)
    B = x_flat.shape[0]
    if B < small_batch_threshold:
        # Small-batch bypass: XLA's fused broadcast-FMA beats the pallas_call
        # launch/step overhead and fuses into the downstream loss for free.
        disc = jnp.asarray(discrimination, jnp.float32).reshape(1, -1)
        off = jnp.asarray(offsets, jnp.float32).reshape(1, -1)
        return (disc * x_flat[:, None] + off).astype(out_dtype)
    # Large batch: lane-dense Pallas kernel.  NOTE: hot-path consumers should
    # call element_wise_affine_kb directly (or keep this call inside a larger
    # jit so XLA fuses the transpose into the consumer) -- a standalone
    # (K,B)->(B,K) transpose roughly 3x's HBM traffic for this store-bound op.
    return element_wise_affine_kb(
        x_flat, discrimination, offsets,
        out_dtype=out_dtype, max_tile_lanes=max_tile_lanes).T


def make_params(with_discrimination, num_labels, key):
    """Deterministic parameter init mirroring ElementWiseAffine.__init__."""
    K = num_labels - 1
    if with_discrimination in ("none", "single"):
        discrimination = jnp.ones((1,), jnp.float32)
    elif with_discrimination == "multi":
        discrimination = jnp.ones((K,), jnp.float32)
    else:
        raise ValueError(f"Unknown discrimination type: {with_discrimination}")
    # reset_parameters: offsets ~ Normal(0, 1), then sorted ascending.
    offsets = jnp.sort(jax.random.normal(key, (K,), jnp.float32))
    return discrimination, offsets


if __name__ == "__main__":
    key = jax.random.PRNGKey(0)
    k_off, k_x = jax.random.split(key)

    num_labels = 9          # -> K = 8 thresholds
    batch = 1000            # non-multiple of the 512 lane tile: exercises ragged last block

    discrimination, offsets = make_params("multi", num_labels, k_off)
    x = jax.random.normal(k_x, (batch, 1), jnp.float32)   # ordered-scale scalar per example

    # Reference (plain JAX, same broadcasting as the torch forward) -> (B, K).
    ref = discrimination.reshape(1, -1) * x + offsets.reshape(1, -1)

    # 1) Lane-dense transposed fast path: the kernel's native (K, B) contract.
    #    Small max_tile_lanes so the demo runs a 2-step parallel grid + ragged edge.
    out_kb = jax.block_until_ready(
        element_wise_affine_kb(x, discrimination, offsets, max_tile_lanes=512))
    assert out_kb.shape == (num_labels - 1, batch)
    assert jnp.allclose(out_kb.T, ref, atol=1e-6, rtol=1e-6)

    # 2) PyTorch-parity (B, K) wrapper through the Pallas path (threshold forced to 0)...
    out_bk = jax.block_until_ready(
        element_wise_affine(x, discrimination, offsets, max_tile_lanes=512,
                            small_batch_threshold=0))
    assert out_bk.shape == (batch, num_labels - 1)
    assert jnp.allclose(out_bk, ref, atol=1e-6, rtol=1e-6)

    # ... and through the default small-batch XLA bypass.
    out_bypass = jax.block_until_ready(element_wise_affine(x, discrimination, offsets))
    assert jnp.allclose(out_bypass, ref, atol=1e-6, rtol=1e-6)

    # 3) "single" discrimination mode through the same kernel path.
    disc_s, off_s = make_params("single", num_labels, k_off)
    out_s = jax.block_until_ready(
        element_wise_affine_kb(x, disc_s, off_s, max_tile_lanes=512))
    ref_s = disc_s.reshape(1, -1) * x + off_s.reshape(1, -1)
    assert jnp.allclose(out_s.T, ref_s, atol=1e-6, rtol=1e-6)

    # 4) Optional narrow output dtype (halves the binding store stream).
    out_bf16 = jax.block_until_ready(
        element_wise_affine_kb(x, discrimination, offsets,
                               out_dtype=jnp.bfloat16, max_tile_lanes=512))
    assert out_bf16.dtype == jnp.bfloat16
    assert jnp.allclose(out_bf16.T.astype(jnp.float32), ref, atol=5e-2, rtol=5e-2)

    print("KERNEL_OK")
</pallas_src>

<mosaic_0001>
module attributes {stable_mosaic.version = 11 : i64} {
  func.func @_affine_kernel(%arg0: i32, %arg1: memref<8x1xf32, #tpu.memory_space<vmem>>, %arg2: memref<8x1xf32, #tpu.memory_space<vmem>>, %arg3: memref<1x512xf32, #tpu.memory_space<vmem>>, %arg4: memref<8x512xf32, #tpu.memory_space<vmem>>) attributes {dimension_semantics = [#tpu.dimension_semantics<parallel>], iteration_bounds = array<i64: 2>, scalar_prefetch = 0 : i64, scratch_operands = 0 : i64, tpu.core_type = #tpu.core_type<tc>, window_params = [{pipeline_mode = #tpu.pipeline_mode<synchronous>, transform_indices = @transform_0, window_bounds = array<i64: 8, 1>}, {pipeline_mode = #tpu.pipeline_mode<synchronous>, transform_indices = @transform_1, window_bounds = array<i64: 8, 1>}, {transform_indices = @transform_2, window_bounds = array<i64: 1, 512>}, {transform_indices = @transform_3, window_bounds = array<i64: 8, 512>}]} {
    %c0 = arith.constant 0 : index
    %c0_0 = arith.constant 0 : index
    %0 = vector.load %arg1[%c0, %c0_0] : memref<8x1xf32, #tpu.memory_space<vmem>>, vector<8x1xf32>
    %c0_1 = arith.constant 0 : index
    %c0_2 = arith.constant 0 : index
    %1 = vector.load %arg3[%c0_1, %c0_2] : memref<1x512xf32, #tpu.memory_space<vmem>>, vector<1x512xf32>
    %2 = vector.broadcast %0 : vector<8x1xf32> to vector<8x512xf32>
    %3 = vector.broadcast %1 : vector<1x512xf32> to vector<8x512xf32>
    %4 = arith.mulf %2, %3 : vector<8x512xf32>
    %c0_3 = arith.constant 0 : index
    %c0_4 = arith.constant 0 : index
    %5 = vector.load %arg2[%c0_3, %c0_4] : memref<8x1xf32, #tpu.memory_space<vmem>>, vector<8x1xf32>
    %6 = vector.broadcast %5 : vector<8x1xf32> to vector<8x512xf32>
    %7 = arith.addf %4, %6 : vector<8x512xf32>
    %c0_5 = arith.constant 0 : index
    %c0_6 = arith.constant 0 : index
    %8 = vector.load %arg4[%c0_5, %c0_6] : memref<8x512xf32, #tpu.memory_space<vmem>>, vector<8x512xf32>
    tpu.vector_store %arg4[%c0_5, %c0_6], %7 {strides = array<i32>} : memref<8x512xf32, #tpu.memory_space<vmem>>, vector<8x512xf32>,
    return
  }
  func.func @transform_0(%arg0: i32) -> (i32, i32) {
    %c0_i32 = arith.constant 0 : i32
    %c0_i32_0 = arith.constant 0 : i32
    %c0_i32_1 = arith.constant 0 : i32
    return %c0_i32, %c0_i32_0 : i32, i32
  }
  func.func @transform_1(%arg0: i32) -> (i32, i32) {
    %c0_i32 = arith.constant 0 : i32
    %c0_i32_0 = arith.constant 0 : i32
    %c0_i32_1 = arith.constant 0 : i32
    return %c0_i32, %c0_i32_0 : i32, i32
  }
  func.func @transform_2(%arg0: i32) -> (i32, i32) {
    %c0_i32 = arith.constant 0 : i32
    %c0_i32_0 = arith.constant 0 : i32
    return %c0_i32, %arg0 : i32, i32
  }
  func.func @transform_3(%arg0: i32) -> (i32, i32) {
    %c0_i32 = arith.constant 0 : i32
    %c0_i32_0 = arith.constant 0 : i32
    return %c0_i32, %arg0 : i32, i32
  }
}

</mosaic_0001>

<bundles_post_ra>
// kernel: tpu_custom_call.1
= control target key start
LH: loop header
LB: loop body
LE: loop exit
PB: predicated region body
PF: predicated region fallthrough
CT: control target
= control target key end

     0   :  { %8 = vsyncpa [#allocation3], 0  ;;  %s531_s0 = inlined_call_operand.vmem [shape: f32[8,1], index: 0, kind: input, shape index: {}]   ;;  %s532_s1 = inlined_call_operand.vmem [shape: f32[8,1], index: 1, kind: input, shape index: {}]   ;;  %s533_s2 = inlined_call_operand.vmem [shape: f32[1,1000], index: 2, kind: input, shape index: {}]   ;;  %s534_s3 = inlined_call_operand.hbm [shape: f32[8,1000], index: 3, kind: output, shape index: {}]  }
   0x1   :  { %10 = vsyncpa [#allocation3 + $0x1], 0  ;;  %s423_s12 = smov 0   ;;  %s425_s13 = smov 0  }
   0x2   :  { %s427_s14 = smov 0   ;;  %s429_s15 = smov 0  }
   0x3 LB: > { %s444_s16 = sadd.s32 4294967295, %s399_s15   ;;  %s286_s17 = sadd.s32 4294967294, %s399_s15   ;;  %s399_s15 = sphi %s429_s15, %s540_s15   ;;  %s395_s14 = sphi %s427_s14, %s539_s14   ;;  %s391_s13 = sphi %s425_s13, %s538_s13   ;;  %s387_s12 = sphi %s423_s12, %s537_s12  }
   0x4   : > { %s448_s18 = sadd.s32 1, %s399_s15   ;;  %s91_s19 = sadd.s32 1, %s395_s14 }
   0x5   : > { %s88_s20 = ssub.s32 %s399_s15, %s448_s18  ;;  %p101_p0 = scmp.ne.s32.totalorder %s395_s14, %s391_s13 }
   0x6   : > { %p89_p1 = scmp.eq.s32.totalorder %s88_s20, 0  ;;  %p102_p2 = scmp.eq.s32.totalorder %s444_s16, 1 }
   0x7   : > { %p107_p3 = scmp.ne.s32.totalorder %s391_s13, %s387_s12  ;;  %p108_p4 = scmp.eq.s32.totalorder %s286_s17, 1 }
   0x8   : > { %s459_s21 = scalar_select %p89_p1, %s395_s14, %s91_s19  }
   0x9   : > { %p461_p5 = por %p102_p2, %p101_p0  ;;  %p465_p6 = por %p108_p4, %p107_p3 }
   0xa   : > { %p289_p7 = scmp.ge.s32.totalorder %s399_s15, 1  ;;  %p140_p8 = scmp.lt.s32.totalorder %s399_s15, 3 }
   0xc   : > { %p141_p9 = pnand %p289_p7, %p140_p8 }
   0xd   : > { %s291_s28 = sshll.u32 (!%p141_p9), %s444_s16, 2  ;;  %s160_s29 = sand.u32 (!%p141_p9), 1, %s391_s13  }
   0xe   : > { %144 = sbr.rel (%p141_p9) target bundleno = 165 (0xa5), region = 32  ;;  %p164_p10 = scmp.lt.s32.totalorder (!%p141_p9), %s291_s28, 7 }
   0xf   : > { %s290_s6 = sshll.u32 (!%p141_p9), %s160_s29, 5  ;;  %s297_s7 = sshll.u32 (!%p141_p9), %s444_s16, 9 }
  0x10   : > { %s162_s8 = scalar_lea.vmem (!%p141_p9), [#allocation2], %s290_s6  ;;  %s488_s17 = scalar_lea.hbm (!%p141_p9), %s534_s3, %s297_s7 }
  0x11   : > { %s230_s9 = sshll.u32 (!%p141_p9), %s162_s8, 4  ;;  %s216_s16 = scalar_lea.sflag (!%p141_p9), [#allocation3], %s160_s29  ;;  %s490_s9 = int_to_ptr.vmem [resolvable:$true] %s230_s9 }
  0x12   : > { %s339_s19 = scalar_lea.vmem (!%p141_p9), %s490_s9, 512  ;;  %s402_s20 = smov (!%p141_p9), [#allocation2]  }
  0x13   : > { %v169_v0 = vld [vmem:[%s531_s0] sm:$0xff]  ;;  %v401_v1 = vmov 0   ;;  %v177_v3 = vlaneseq  ;;  %s542_s28 = smov (!%p164_p10, %s291_s28), 7  ;;  %p340_p11 = scmp.ne.s32.totalorder %s490_s9, %s339_s19 }
  0x14   : > { %338 = vset.pattern.permute.xlu0 %v401_v1  ;;  %v201_v2 = vld [vmem:[%s532_s1] sm:$0xff]  ;;  %s166_s5 = scalar_lea.vmem %s533_s2, %s542_s28  ;;  %s343_s24 = sshll.u32 %s402_s20, 4  ;;  %s344_s24 = int_to_ptr.vmem [resolvable:$false] %s343_s24 }
  0x15   : > { %173 = vperm.xlu0 %338, %v169_v0   ;;  %v178_v4 = vshrl.u32 %v177_v3, 7  ;;  %v170_v9 = vld [vmem:[%s166_s5] sm:$0xf]  ;;  %p341_p12 = pnand %p340_p11, %p461_p5  ;;  %s345_s25 = scalar_lea.vmem %s344_s24, 1024 }
  0x16   : > { %p346_p0 = scmp.lt.s32.totalorder %s490_s9, %s344_s24  ;;  %p347_p1 = scmp.lt.s32.totalorder %s345_s25, %s339_s19 }
  0x17   : > { %v179_v5 = vsub.s32 0, %v178_v4  ;;  %v183_v6 = vsub.s32 1, %v178_v4  ;;  %v187_v7 = vsub.s32 2, %v178_v4  ;;  %v191_v8 = vsub.s32 3, %v178_v4  ;;  %p342_p13 = pneg %p341_p12 }
  0x18   : > { %p348_p2 = por %p347_p1, %p346_p0 }
  0x19   : > { %204 = vperm.xlu0 %338, %v201_v2   ;;  %v180_v10 = vrot.slane %v170_v9, %v179_v5  ;;  %v184_v11 = vrot.slane %v170_v9, %v183_v6  ;;  %v188_v12 = vrot.slane %v170_v9, %v187_v7  ;;  %v192_v13 = vrot.slane %v170_v9, %v191_v8 }
  0x1a   : > { %p349_p3 = pnand %p348_p2, %p342_p13 }
  0x90   : > { %v174_v14 = vpop.permute.xlu0 %173 }
  0x91   : > { %v197_v15 = vmul.f32 %v180_v10, %v174_v14  ;;  %v198_v16 = vmul.f32 %v184_v11, %v174_v14  ;;  %v199_v17 = vmul.f32 %v188_v12, %v174_v14  ;;  %v200_v18 = vmul.f32 %v192_v13, %v174_v14 }
  0x94   : > { %v205_v19 = vpop.permute.xlu0 %204 }
  0x95   : > { %v207_v20 = vadd.f32 %v205_v19, %v197_v15  ;;  %v208_v21 = vadd.f32 %v205_v19, %v198_v16  ;;  %v209_v22 = vadd.f32 %v205_v19, %v199_v17  ;;  %v210_v23 = vadd.f32 %v205_v19, %v200_v18 }
  0x97   : > { %211 = vst [vmem:[%s162_s8] sm:$0xff] %v207_v20  ;;  %212 = vst [vmem:[%s162_s8 + $0x8] sm:$0xff] %v208_v21 }
  0x98   : > { %213 = vst [vmem:[%s162_s8 + $0x10] sm:$0xff] %v209_v22  ;;  %214 = vst [vmem:[%s162_s8 + $0x18] sm:$0xff] %v210_v23 }
  0x99   : > { %352 = shalt.err (!%p349_p3)
}
  0x9a   : > { %s353_s26 = scalar_lea.hbm %s488_s17, 512  ;;  %s357_s29 = scalar_lea.hbm %s534_s3, 1024 }
  0x9b   : > { %p354_p4 = scmp.ne.s32.totalorder %s488_s17, %s353_s26  ;;  %p358_p9 = scmp.lt.s32.totalorder %s488_s17, %s534_s3 }
  0x9c   : > { %p359_p10 = scmp.lt.s32.totalorder %s357_s29, %s353_s26 }
  0x9d   : > { %p355_p7 = pnand %p354_p4, %p461_p5 }
  0x9e   : > { %p360_p11 = por %p359_p10, %p358_p9 }
  0x9f   : > { %p356_p8 = pneg %p355_p7 }
  0xa1   : > { %p361_p12 = pnand %p360_p11, %p356_p8 }
  0xa3   : > { %364 = shalt.err (!%p361_p12)
}
  0xa4   : > { %298 = dma.vmem_to_hbm [thread:$0]  (%p461_p5), %s490_s9, 512, %s488_s17, %s216_s16  }
  0xa5 PF: > { %p304_p13 = scmp.ge.s32.totalorder %s399_s15, 2  ;;  %s242_s5 = sand.u32 1, %s387_s12  }
  0xa6   : > { %s243_s6 = scalar_lea.sflag [#allocation3], %s242_s5 }
  0xa7   : > { %p301_p0 = pnand %p304_p13, %p465_p6 }
  0xa9   : > { %p302_p1 = pneg %p301_p0 }
  0xab   : > { %382 = dma.done.wait (%p302_p1), %s243_s6, 512  }
  0xac   : > { %384 = vsyncadd (%p302_p1), %s243_s6, 4294966784  ;;  %p13_p2 = scmp.ge.s32.totalorder %s448_s18, 4   ;;  %s537_s12 = smov %s391_s13 }
  0xad   : > { %s538_s13 = smov %s395_s14  ;;  %s539_s14 = smov %s459_s21 }
  0xae   : > { %s540_s15 = smov %s448_s18  ;;  %15 = sbr.rel (!%p13_p2) target bundleno = 3 (0x3), region = 67 }
  0xb3   :  { %248 = vsyncpa [#allocation3], 1 }
  0xb4   :  { %250 = vsyncpa [#allocation3 + $0x1], 1 }

</bundles_post_ra>
